<compile_context>
chip_gen: v6e
topology: v6e:2x2x1
jax: 0.10.0
libtpu: 0.0.40
codegen_flags: <defaults>
</compile_context>

<pallas_src>
import functools

import jax
import jax.numpy as jnp
from jax import lax
from jax.experimental import pallas as pl
from jax.experimental.pallas import tpu as pltpu  # noqa: F401  (kept for the large-N TODO path)


# ----------------------------------------------------------------------------
# Fused kernel
# ----------------------------------------------------------------------------

def _gat_prop_layer(x_in, w_all, a_srcT, a_dd, bias1, bias2, *, heads, out_ch, concat):
    """One GAT_prop layer, fully in-registers/VMEM.

    x_in   : (N, F_in)        input node features (values, not a ref)
    w_all  : (F_in, 3*H*C)    [W_src | W_dst | W_dst2]
    a_srcT : (H, 3*H*C)       block rows: att_src[h] at cols h*C:(h+1)*C, zeros elsewhere
    a_dd   : (3*H*C, 2*H)     col h   <- att_dst[h]  at rows HC  + h*C ...
                              col H+h <- att_dst2[h] at rows 2HC + h*C ...
    bias1  : (N, N)           additive 1-hop mask bias (0 on edges, -1e30 otherwise) [dst, src]
    bias2  : (N, N)           additive 2-hop mask bias, same layout
    """
    N = x_in.shape[0]
    H, C = heads, out_ch
    HC = H * C

    # Single fused projection for lin_src / lin_dst / lin_dst2.
    xp = jnp.dot(x_in, w_all, preferred_element_type=jnp.float32)              # (N, 3HC)

    # Per-head src logits as ROWS (H, N): one tiny A @ B.T MXU op (no transpose needed).
    a_src_rows = lax.dot_general(a_srcT, xp, (((1,), (1,)), ((), ())),
                                 preferred_element_type=jnp.float32)           # (H, N)
    # Per-head dst / dst2 logits as COLUMNS (N, 2H): one MXU op replaces 4H lane reductions.
    a_dd_cols = jnp.dot(xp, a_dd, preferred_element_type=jnp.float32)          # (N, 2H)

    slope = jnp.float32(0.2)
    rows = []
    for h in range(H):                                    # H is static (1 or 2) -> unrolled
        src_row = a_src_rows[h:h + 1, :]                                        # (1, N)
        for hop, bias in ((0, bias1), (1, bias2)):
            dst_col = a_dd_cols[:, hop * H + h:hop * H + h + 1]                 # (N, 1)
            s = dst_col + src_row                                               # (N, N) [dst, src]
            s = jnp.where(s > 0, s, slope * s) + bias       # leaky_relu(0.2) + additive mask
            rows.append(s)

    # Batch every (head, hop) score matrix: one softmax pass + one aggregation matmul.
    S = jnp.concatenate(rows, axis=0)                                           # (2HN, N)
    m = jnp.max(S, axis=-1, keepdims=True)
    e = jnp.exp(S - m)                                      # masked entries underflow to 0
    denom = jnp.sum(e, axis=-1, keepdims=True)              # >= 1 (self loop in every row)
    p = e * pl.reciprocal(denom, approx=True)               # attention dropout(p=0) -> identity

    xs = xp[:, 0:HC]                                        # x_src slab (N, HC), prefix slice
    agg = jnp.dot(p, xs, preferred_element_type=jnp.float32)                    # (2HN, HC)

    # Keep only the per-head diagonal blocks (row block 2h = 1-hop, 2h+1 = 2-hop).
    outs1 = [agg[(2 * h) * N:(2 * h + 1) * N, h * C:(h + 1) * C] for h in range(H)]
    outs2 = [agg[(2 * h + 1) * N:(2 * h + 2) * N, h * C:(h + 1) * C] for h in range(H)]

    if concat:
        # Matches out.view(-1, H*C): [out1_h0 | ... | out1_h(H-1) | out2_h0 | ...]
        return jnp.concatenate(outs1 + outs2, axis=-1)                          # (N, 2HC)
    o1 = outs1[0]
    o2 = outs2[0]
    for h in range(1, H):
        o1 = o1 + outs1[h]
        o2 = o2 + outs2[h]
    inv_h = jnp.float32(1.0 / H)
    return jnp.concatenate([o1 * inv_h, o2 * inv_h], axis=-1)                   # (N, 2C)


def _gat_net2_kernel(x_ref, m1_ref, w1_ref, as1_ref, ad1_ref,
                     w2_ref, as2_ref, ad2_ref, o_ref, *, h1, c1, h2, c2):
    """Whole GAT_Net2 forward: mask2, layer 1 + ELU, layer 2 + log_softmax."""
    x = x_ref[...]
    mask1 = m1_ref[...]                                     # (N, N) [dst, src], self loops added

    big = jnp.float32(1e30)
    bias1 = (mask1 - 1.0) * big                             # 0 on edges, -1e30 on non-edges
    two_hop = jnp.dot(mask1, mask1, preferred_element_type=jnp.float32)
    bias2 = jnp.where(two_hop > 0, jnp.float32(0.0), -big)  # 2-hop mask (superset of 1-hop)

    # Layer 1 (concat=True) + ELU.  F.dropout(p=0) -> identity on both sides.
    h = _gat_prop_layer(x, w1_ref[...], as1_ref[...], ad1_ref[...], bias1, bias2,
                        heads=h1, out_ch=c1, concat=True)                       # (N, 2*H1*C1)
    h = jnp.where(h > 0, h, jnp.exp(jnp.minimum(h, 0.0)) - 1.0)                 # ELU, clamped exp

    # Layer 2 (concat=False, head mean).
    z = _gat_prop_layer(h, w2_ref[...], as2_ref[...], ad2_ref[...], bias1, bias2,
                        heads=h2, out_ch=c2, concat=False)                      # (N, 2*C2)

    # log_softmax over the class axis.
    zm = jnp.max(z, axis=-1, keepdims=True)
    lse = jnp.log(jnp.sum(jnp.exp(z - zm), axis=-1, keepdims=True))
    o_ref[...] = z - zm - lse                               # single full-width store


# ----------------------------------------------------------------------------
# Wrapper
# ----------------------------------------------------------------------------

@jax.jit
def gat_net2_forward(x, edge_index, packed1, packed2):
    N = x.shape[0]
    src, dst = edge_index[0], edge_index[1]
    eye = jnp.eye(N, dtype=jnp.float32)
    # Dense 1-hop mask scattered directly in [dst, src] order (== adj.T); remove then
    # re-add self loops.  Scatter from the edge list is done with XLA outside the kernel.
    adj_ds = jnp.zeros((N, N), jnp.float32).at[dst, src].set(1.0)
    mask1 = adj_ds * (1.0 - eye) + eye

    w1, as1, ad1 = packed1
    w2, as2, ad2 = packed2
    h1 = as1.shape[0]
    c1 = as1.shape[1] // (3 * h1)
    h2 = as2.shape[0]
    c2 = as2.shape[1] // (3 * h2)

    kern = functools.partial(_gat_net2_kernel, h1=h1, c1=c1, h2=h2, c2=c2)
    return pl.pallas_call(
        kern,
        out_shape=jax.ShapeDtypeStruct((N, 2 * c2), jnp.float32),
    )(x, mask1, w1, as1, ad1, w2, as2, ad2)


# ----------------------------------------------------------------------------
# Parameter init / packing
# ----------------------------------------------------------------------------

def glorot(key, shape, fan_in, fan_out):
    a = jnp.sqrt(6.0 / (fan_in + fan_out))
    return jax.random.uniform(key, shape, jnp.float32, -a, a)


def init_gat_prop_params(key, in_ch, out_ch, heads):
    # Mirrors GAT_prop.__init__: lin_src / lin_dst / lin_dst2 (glorot, no bias) and
    # att_src / att_dst / att_dst2 of shape (1, heads, out_ch), stored here as (heads, out_ch).
    # NOTE: GAT_prop.bias is allocated in __init__ but never used in forward() -> omitted.
    ks = jax.random.split(key, 6)
    hc = heads * out_ch
    w_src = glorot(ks[0], (in_ch, hc), in_ch, hc)
    w_dst = glorot(ks[1], (in_ch, hc), in_ch, hc)
    w_dst2 = glorot(ks[2], (in_ch, hc), in_ch, hc)
    att_src = glorot(ks[3], (heads, out_ch), heads, out_ch)
    att_dst = glorot(ks[4], (heads, out_ch), heads, out_ch)
    att_dst2 = glorot(ks[5], (heads, out_ch), heads, out_ch)
    return (w_src, w_dst, w_dst2, att_src, att_dst, att_dst2)


def pack_gat_prop_params(params):
    """Pack the three projections + block-diagonal attention matrices (done once, offline)."""
    w_src, w_dst, w_dst2, att_src, att_dst, att_dst2 = params
    H, C = att_src.shape
    HC = H * C
    w_all = jnp.concatenate([w_src, w_dst, w_dst2], axis=1)          # (F_in, 3*H*C)

    # a_srcT: (H, 3HC) so that  a_srcT @ xp.T  -> per-head alpha_src rows (H, N)
    a_srcT = jnp.zeros((H, 3 * HC), jnp.float32)
    # a_dd: (3HC, 2H) so that  xp @ a_dd  -> [alpha_dst heads | alpha_dst2 heads] columns (N, 2H)
    a_dd = jnp.zeros((3 * HC, 2 * H), jnp.float32)
    for h in range(H):
        a_srcT = a_srcT.at[h, h * C:(h + 1) * C].set(att_src[h])
        a_dd = a_dd.at[HC + h * C:HC + (h + 1) * C, h].set(att_dst[h])
        a_dd = a_dd.at[2 * HC + h * C:2 * HC + (h + 1) * C, H + h].set(att_dst2[h])
    return (w_all, a_srcT, a_dd)


# ----------------------------------------------------------------------------

if __name__ == "__main__":
    key = jax.random.PRNGKey(0)
    N = 16            # number of graph nodes
    F_IN = 16         # dataset.num_features
    HIDDEN = 8        # args.hidden
    HEADS = 2         # args.heads
    OUT_HEADS = 1     # args.output_heads
    NUM_CLASSES = 4   # dataset.num_classes
    E = 40            # number of directed edges

    kx, ke, kp1, kp2 = jax.random.split(key, 4)
    x = jax.random.normal(kx, (N, F_IN), jnp.float32)
    src = jax.random.randint(ke, (E,), 0, N, dtype=jnp.int32)
    dst = jax.random.randint(jax.random.fold_in(ke, 1), (E,), 0, N, dtype=jnp.int32)
    edge_index = jnp.stack([src, dst], axis=0)

    params1 = init_gat_prop_params(kp1, F_IN, HIDDEN, HEADS)
    params2 = init_gat_prop_params(kp2, HIDDEN * HEADS * 2, NUM_CLASSES, OUT_HEADS)
    packed1 = pack_gat_prop_params(params1)
    packed2 = pack_gat_prop_params(params2)

    out = gat_net2_forward(x, edge_index, packed1, packed2)
    out = jax.block_until_ready(out)

    assert out.shape == (N, 2 * NUM_CLASSES), out.shape
    assert bool(jnp.all(jnp.isfinite(out)))
    # log_softmax rows should (approximately) sum to 1 in prob space
    assert bool(jnp.all(jnp.abs(jnp.sum(jnp.exp(out), axis=-1) - 1.0) < 1e-3))
    print("KERNEL_OK")
</pallas_src>

<mosaic_0001>
module attributes {stable_mosaic.version = 11 : i64} {
  func.func @_gat_net2_kernel(%arg0: memref<16x16xf32, #tpu.memory_space<vmem>>, %arg1: memref<16x16xf32, #tpu.memory_space<vmem>>, %arg2: memref<16x48xf32, #tpu.memory_space<vmem>>, %arg3: memref<2x48xf32, #tpu.memory_space<vmem>>, %arg4: memref<48x4xf32, #tpu.memory_space<vmem>>, %arg5: memref<32x12xf32, #tpu.memory_space<vmem>>, %arg6: memref<1x12xf32, #tpu.memory_space<vmem>>, %arg7: memref<12x2xf32, #tpu.memory_space<vmem>>, %arg8: memref<16x8xf32, #tpu.memory_space<vmem>>) attributes {dimension_semantics = [], scalar_prefetch = 0 : i64, scratch_operands = 0 : i64, tpu.core_type = #tpu.core_type<tc>} {
    %c0 = arith.constant 0 : index
    %c0_0 = arith.constant 0 : index
    %0 = vector.load %arg0[%c0, %c0_0] : memref<16x16xf32, #tpu.memory_space<vmem>>, vector<16x16xf32>
    %c0_1 = arith.constant 0 : index
    %c0_2 = arith.constant 0 : index
    %1 = vector.load %arg1[%c0_1, %c0_2] : memref<16x16xf32, #tpu.memory_space<vmem>>, vector<16x16xf32>
    %cst = arith.constant 1.000000e+00 : f32
    %2 = vector.broadcast %cst : f32 to vector<16x16xf32>
    %3 = arith.subf %1, %2 : vector<16x16xf32>
    %cst_3 = arith.constant 1.000000e+30 : f32
    %4 = vector.broadcast %cst_3 : f32 to vector<16x16xf32>
    %5 = arith.mulf %3, %4 : vector<16x16xf32>
    %cst_4 = arith.constant dense<0.000000e+00> : vector<16x16xf32>
    %6 = tpu.matmul %1, %1, %cst_4 {dimension_numbers = #tpu.dot_dimension_numbers<[1], [0], [0], [1], [0, 0, 1, 1], [], []>} : vector<16x16xf32>, vector<16x16xf32>, vector<16x16xf32> -> vector<16x16xf32>
    %cst_5 = arith.constant 0.000000e+00 : f32
    %7 = vector.broadcast %cst_5 : f32 to vector<16x16xf32>
    %8 = arith.cmpf ogt, %6, %7 : vector<16x16xf32>
    %cst_6 = arith.constant 0.000000e+00 : f32
    %cst_7 = arith.constant 1.000000e+30 : f32
    %9 = arith.subf %cst_6, %cst_7 : f32
    %cst_8 = arith.constant 0.000000e+00 : f32
    %10 = vector.broadcast %cst_8 : f32 to vector<16x16xf32>
    %11 = vector.broadcast %9 : f32 to vector<16x16xf32>
    %12 = arith.select %8, %10, %11 : vector<16x16xi1>, vector<16x16xf32>
    %c0_9 = arith.constant 0 : index
    %c0_10 = arith.constant 0 : index
    %13 = vector.load %arg2[%c0_9, %c0_10] : memref<16x48xf32, #tpu.memory_space<vmem>>, vector<16x48xf32>
    %c0_11 = arith.constant 0 : index
    %c0_12 = arith.constant 0 : index
    %14 = vector.load %arg3[%c0_11, %c0_12] : memref<2x48xf32, #tpu.memory_space<vmem>>, vector<2x48xf32>
    %c0_13 = arith.constant 0 : index
    %c0_14 = arith.constant 0 : index
    %15 = vector.load %arg4[%c0_13, %c0_14] : memref<48x4xf32, #tpu.memory_space<vmem>>, vector<48x4xf32>
    %cst_15 = arith.constant dense<0.000000e+00> : vector<16x48xf32>
    %16 = tpu.matmul %0, %13, %cst_15 {dimension_numbers = #tpu.dot_dimension_numbers<[1], [0], [0], [1], [0, 0, 1, 1], [], []>} : vector<16x16xf32>, vector<16x48xf32>, vector<16x48xf32> -> vector<16x48xf32>
    %cst_16 = arith.constant dense<0.000000e+00> : vector<2x16xf32>
    %17 = tpu.matmul %14, %16, %cst_16 {dimension_numbers = #tpu.dot_dimension_numbers<[1], [1], [0], [0], [0, 0, 1, 0], [], []>} : vector<2x48xf32>, vector<16x48xf32>, vector<2x16xf32> -> vector<2x16xf32>
    %cst_17 = arith.constant dense<0.000000e+00> : vector<16x4xf32>
    %18 = tpu.matmul %16, %15, %cst_17 {dimension_numbers = #tpu.dot_dimension_numbers<[1], [0], [0], [1], [0, 0, 1, 1], [], []>} : vector<16x48xf32>, vector<48x4xf32>, vector<16x4xf32> -> vector<16x4xf32>
    %19 = vector.extract_strided_slice %17 {offsets = [0, 0], sizes = [1, 16], strides = [1, 1]} : vector<2x16xf32> to vector<1x16xf32>
    %20 = vector.extract_strided_slice %18 {offsets = [0, 0], sizes = [16, 1], strides = [1, 1]} : vector<16x4xf32> to vector<16x1xf32>
    %21 = vector.broadcast %20 : vector<16x1xf32> to vector<16x16xf32>
    %22 = vector.broadcast %19 : vector<1x16xf32> to vector<16x16xf32>
    %23 = arith.addf %21, %22 : vector<16x16xf32>
    %cst_18 = arith.constant 0.000000e+00 : f32
    %24 = vector.broadcast %cst_18 : f32 to vector<16x16xf32>
    %25 = arith.cmpf ogt, %23, %24 : vector<16x16xf32>
    %cst_19 = arith.constant 2.000000e-01 : f32
    %26 = vector.broadcast %cst_19 : f32 to vector<16x16xf32>
    %27 = arith.mulf %26, %23 : vector<16x16xf32>
    %28 = arith.select %25, %23, %27 : vector<16x16xi1>, vector<16x16xf32>
    %29 = arith.addf %28, %5 : vector<16x16xf32>
    %30 = vector.extract_strided_slice %18 {offsets = [0, 2], sizes = [16, 1], strides = [1, 1]} : vector<16x4xf32> to vector<16x1xf32>
    %31 = vector.broadcast %30 : vector<16x1xf32> to vector<16x16xf32>
    %32 = vector.broadcast %19 : vector<1x16xf32> to vector<16x16xf32>
    %33 = arith.addf %31, %32 : vector<16x16xf32>
    %cst_20 = arith.constant 0.000000e+00 : f32
    %34 = vector.broadcast %cst_20 : f32 to vector<16x16xf32>
    %35 = arith.cmpf ogt, %33, %34 : vector<16x16xf32>
    %cst_21 = arith.constant 2.000000e-01 : f32
    %36 = vector.broadcast %cst_21 : f32 to vector<16x16xf32>
    %37 = arith.mulf %36, %33 : vector<16x16xf32>
    %38 = arith.select %35, %33, %37 : vector<16x16xi1>, vector<16x16xf32>
    %39 = arith.addf %38, %12 : vector<16x16xf32>
    %40 = vector.extract_strided_slice %17 {offsets = [1, 0], sizes = [1, 16], strides = [1, 1]} : vector<2x16xf32> to vector<1x16xf32>
    %41 = vector.extract_strided_slice %18 {offsets = [0, 1], sizes = [16, 1], strides = [1, 1]} : vector<16x4xf32> to vector<16x1xf32>
    %42 = vector.broadcast %41 : vector<16x1xf32> to vector<16x16xf32>
    %43 = vector.broadcast %40 : vector<1x16xf32> to vector<16x16xf32>
    %44 = arith.addf %42, %43 : vector<16x16xf32>
    %cst_22 = arith.constant 0.000000e+00 : f32
    %45 = vector.broadcast %cst_22 : f32 to vector<16x16xf32>
    %46 = arith.cmpf ogt, %44, %45 : vector<16x16xf32>
    %cst_23 = arith.constant 2.000000e-01 : f32
    %47 = vector.broadcast %cst_23 : f32 to vector<16x16xf32>
    %48 = arith.mulf %47, %44 : vector<16x16xf32>
    %49 = arith.select %46, %44, %48 : vector<16x16xi1>, vector<16x16xf32>
    %50 = arith.addf %49, %5 : vector<16x16xf32>
    %51 = vector.extract_strided_slice %18 {offsets = [0, 3], sizes = [16, 1], strides = [1, 1]} : vector<16x4xf32> to vector<16x1xf32>
    %52 = vector.broadcast %51 : vector<16x1xf32> to vector<16x16xf32>
    %53 = vector.broadcast %40 : vector<1x16xf32> to vector<16x16xf32>
    %54 = arith.addf %52, %53 : vector<16x16xf32>
    %cst_24 = arith.constant 0.000000e+00 : f32
    %55 = vector.broadcast %cst_24 : f32 to vector<16x16xf32>
    %56 = arith.cmpf ogt, %54, %55 : vector<16x16xf32>
    %cst_25 = arith.constant 2.000000e-01 : f32
    %57 = vector.broadcast %cst_25 : f32 to vector<16x16xf32>
    %58 = arith.mulf %57, %54 : vector<16x16xf32>
    %59 = arith.select %56, %54, %58 : vector<16x16xi1>, vector<16x16xf32>
    %60 = arith.addf %59, %12 : vector<16x16xf32>
    %61 = tpu.concatenate %29, %39, %50, %60 in 0 : vector<16x16xf32>, vector<16x16xf32>, vector<16x16xf32>, vector<16x16xf32> -> vector<64x16xf32>
    %cst_26 = arith.constant dense<0xFF800000> : vector<64xf32>
    %62 = vector.multi_reduction <maximumf>, %61, %cst_26 [1] : vector<64x16xf32> to vector<64xf32>
    %63 = vector.shape_cast %62 : vector<64xf32> to vector<64x1xf32>
    %64 = vector.broadcast %63 : vector<64x1xf32> to vector<64x16xf32>
    %65 = arith.subf %61, %64 : vector<64x16xf32>
    %66 = math.exp %65 : vector<64x16xf32>
    %cst_27 = arith.constant dense<0.000000e+00> : vector<64xf32>
    %67 = vector.multi_reduction <add>, %66, %cst_27 [1] : vector<64x16xf32> to vector<64xf32>
    %68 = vector.shape_cast %67 : vector<64xf32> to vector<64x1xf32>
    %69 = tpu.reciprocal %68 {approx = true} : vector<64x1xf32> -> vector<64x1xf32>
    %70 = vector.broadcast %69 : vector<64x1xf32> to vector<64x16xf32>
    %71 = arith.mulf %66, %70 : vector<64x16xf32>
    %72 = vector.extract_strided_slice %16 {offsets = [0, 0], sizes = [16, 16], strides = [1, 1]} : vector<16x48xf32> to vector<16x16xf32>
    %cst_28 = arith.constant dense<0.000000e+00> : vector<64x16xf32>
    %73 = tpu.matmul %71, %72, %cst_28 {dimension_numbers = #tpu.dot_dimension_numbers<[1], [0], [0], [1], [0, 0, 1, 1], [], []>} : vector<64x16xf32>, vector<16x16xf32>, vector<64x16xf32> -> vector<64x16xf32>
    %74 = vector.extract_strided_slice %73 {offsets = [0, 0], sizes = [16, 8], strides = [1, 1]} : vector<64x16xf32> to vector<16x8xf32>
    %75 = vector.extract_strided_slice %73 {offsets = [32, 8], sizes = [16, 8], strides = [1, 1]} : vector<64x16xf32> to vector<16x8xf32>
    %76 = vector.extract_strided_slice %73 {offsets = [16, 0], sizes = [16, 8], strides = [1, 1]} : vector<64x16xf32> to vector<16x8xf32>
    %77 = vector.extract_strided_slice %73 {offsets = [48, 8], sizes = [16, 8], strides = [1, 1]} : vector<64x16xf32> to vector<16x8xf32>
    %78 = tpu.concatenate %74, %75, %76, %77 in 1 : vector<16x8xf32>, vector<16x8xf32>, vector<16x8xf32>, vector<16x8xf32> -> vector<16x32xf32>
    %cst_29 = arith.constant 0.000000e+00 : f32
    %79 = vector.broadcast %cst_29 : f32 to vector<16x32xf32>
    %80 = arith.cmpf ogt, %78, %79 : vector<16x32xf32>
    %cst_30 = arith.constant 0.000000e+00 : f32
    %81 = vector.broadcast %cst_30 : f32 to vector<16x32xf32>
    %82 = arith.minimumf %78, %81 : vector<16x32xf32>
    %83 = math.exp %82 : vector<16x32xf32>
    %cst_31 = arith.constant 1.000000e+00 : f32
    %84 = vector.broadcast %cst_31 : f32 to vector<16x32xf32>
    %85 = arith.subf %83, %84 : vector<16x32xf32>
    %86 = arith.select %80, %78, %85 : vector<16x32xi1>, vector<16x32xf32>
    %c0_32 = arith.constant 0 : index
    %c0_33 = arith.constant 0 : index
    %87 = vector.load %arg5[%c0_32, %c0_33] : memref<32x12xf32, #tpu.memory_space<vmem>>, vector<32x12xf32>
    %c0_34 = arith.constant 0 : index
    %c0_35 = arith.constant 0 : index
    %88 = vector.load %arg6[%c0_34, %c0_35] : memref<1x12xf32, #tpu.memory_space<vmem>>, vector<1x12xf32>
    %c0_36 = arith.constant 0 : index
    %c0_37 = arith.constant 0 : index
    %89 = vector.load %arg7[%c0_36, %c0_37] : memref<12x2xf32, #tpu.memory_space<vmem>>, vector<12x2xf32>
    %cst_38 = arith.constant dense<0.000000e+00> : vector<16x12xf32>
    %90 = tpu.matmul %86, %87, %cst_38 {dimension_numbers = #tpu.dot_dimension_numbers<[1], [0], [0], [1], [0, 0, 1, 1], [], []>} : vector<16x32xf32>, vector<32x12xf32>, vector<16x12xf32> -> vector<16x12xf32>
    %cst_39 = arith.constant dense<0.000000e+00> : vector<1x16xf32>
    %91 = tpu.matmul %88, %90, %cst_39 {dimension_numbers = #tpu.dot_dimension_numbers<[1], [1], [0], [0], [0, 0, 1, 0], [], []>} : vector<1x12xf32>, vector<16x12xf32>, vector<1x16xf32> -> vector<1x16xf32>
    %cst_40 = arith.constant dense<0.000000e+00> : vector<16x2xf32>
    %92 = tpu.matmul %90, %89, %cst_40 {dimension_numbers = #tpu.dot_dimension_numbers<[1], [0], [0], [1], [0, 0, 1, 1], [], []>} : vector<16x12xf32>, vector<12x2xf32>, vector<16x2xf32> -> vector<16x2xf32>
    %93 = vector.extract_strided_slice %92 {offsets = [0, 0], sizes = [16, 1], strides = [1, 1]} : vector<16x2xf32> to vector<16x1xf32>
    %94 = vector.broadcast %93 : vector<16x1xf32> to vector<16x16xf32>
    %95 = vector.broadcast %91 : vector<1x16xf32> to vector<16x16xf32>
    %96 = arith.addf %94, %95 : vector<16x16xf32>
    %cst_41 = arith.constant 0.000000e+00 : f32
    %97 = vector.broadcast %cst_41 : f32 to vector<16x16xf32>
    %98 = arith.cmpf ogt, %96, %97 : vector<16x16xf32>
    %cst_42 = arith.constant 2.000000e-01 : f32
    %99 = vector.broadcast %cst_42 : f32 to vector<16x16xf32>
    %100 = arith.mulf %99, %96 : vector<16x16xf32>
    %101 = arith.select %98, %96, %100 : vector<16x16xi1>, vector<16x16xf32>
    %102 = arith.addf %101, %5 : vector<16x16xf32>
    %103 = vector.extract_strided_slice %92 {offsets = [0, 1], sizes = [16, 1], strides = [1, 1]} : vector<16x2xf32> to vector<16x1xf32>
    %104 = vector.broadcast %103 : vector<16x1xf32> to vector<16x16xf32>
    %105 = vector.broadcast %91 : vector<1x16xf32> to vector<16x16xf32>
    %106 = arith.addf %104, %105 : vector<16x16xf32>
    %cst_43 = arith.constant 0.000000e+00 : f32
    %107 = vector.broadcast %cst_43 : f32 to vector<16x16xf32>
    %108 = arith.cmpf ogt, %106, %107 : vector<16x16xf32>
    %cst_44 = arith.constant 2.000000e-01 : f32
    %109 = vector.broadcast %cst_44 : f32 to vector<16x16xf32>
    %110 = arith.mulf %109, %106 : vector<16x16xf32>
    %111 = arith.select %108, %106, %110 : vector<16x16xi1>, vector<16x16xf32>
    %112 = arith.addf %111, %12 : vector<16x16xf32>
    %113 = tpu.concatenate %102, %112 in 0 : vector<16x16xf32>, vector<16x16xf32> -> vector<32x16xf32>
    %cst_45 = arith.constant dense<0xFF800000> : vector<32xf32>
    %114 = vector.multi_reduction <maximumf>, %113, %cst_45 [1] : vector<32x16xf32> to vector<32xf32>
    %115 = vector.shape_cast %114 : vector<32xf32> to vector<32x1xf32>
    %116 = vector.broadcast %115 : vector<32x1xf32> to vector<32x16xf32>
    %117 = arith.subf %113, %116 : vector<32x16xf32>
    %118 = math.exp %117 : vector<32x16xf32>
    %cst_46 = arith.constant dense<0.000000e+00> : vector<32xf32>
    %119 = vector.multi_reduction <add>, %118, %cst_46 [1] : vector<32x16xf32> to vector<32xf32>
    %120 = vector.shape_cast %119 : vector<32xf32> to vector<32x1xf32>
    %121 = tpu.reciprocal %120 {approx = true} : vector<32x1xf32> -> vector<32x1xf32>
    %122 = vector.broadcast %121 : vector<32x1xf32> to vector<32x16xf32>
    %123 = arith.mulf %118, %122 : vector<32x16xf32>
    %124 = vector.extract_strided_slice %90 {offsets = [0, 0], sizes = [16, 4], strides = [1, 1]} : vector<16x12xf32> to vector<16x4xf32>
    %cst_47 = arith.constant dense<0.000000e+00> : vector<32x4xf32>
    %125 = tpu.matmul %123, %124, %cst_47 {dimension_numbers = #tpu.dot_dimension_numbers<[1], [0], [0], [1], [0, 0, 1, 1], [], []>} : vector<32x16xf32>, vector<16x4xf32>, vector<32x4xf32> -> vector<32x4xf32>
    %126 = vector.extract_strided_slice %125 {offsets = [0, 0], sizes = [16, 4], strides = [1, 1]} : vector<32x4xf32> to vector<16x4xf32>
    %127 = vector.extract_strided_slice %125 {offsets = [16, 0], sizes = [16, 4], strides = [1, 1]} : vector<32x4xf32> to vector<16x4xf32>
    %cst_48 = arith.constant 1.000000e+00 : f32
    %128 = vector.broadcast %cst_48 : f32 to vector<16x4xf32>
    %129 = arith.mulf %126, %128 : vector<16x4xf32>
    %cst_49 = arith.constant 1.000000e+00 : f32
    %130 = vector.broadcast %cst_49 : f32 to vector<16x4xf32>
    %131 = arith.mulf %127, %130 : vector<16x4xf32>
    %132 = tpu.concatenate %129, %131 in 1 : vector<16x4xf32>, vector<16x4xf32> -> vector<16x8xf32>
    %cst_50 = arith.constant dense<0xFF800000> : vector<16xf32>
    %133 = vector.multi_reduction <maximumf>, %132, %cst_50 [1] : vector<16x8xf32> to vector<16xf32>
    %134 = vector.shape_cast %133 : vector<16xf32> to vector<16x1xf32>
    %135 = vector.broadcast %134 : vector<16x1xf32> to vector<16x8xf32>
    %136 = arith.subf %132, %135 : vector<16x8xf32>
    %137 = math.exp %136 : vector<16x8xf32>
    %cst_51 = arith.constant dense<0.000000e+00> : vector<16xf32>
    %138 = vector.multi_reduction <add>, %137, %cst_51 [1] : vector<16x8xf32> to vector<16xf32>
    %139 = vector.shape_cast %138 : vector<16xf32> to vector<16x1xf32>
    %140 = math.log %139 : vector<16x1xf32>
    %141 = vector.broadcast %134 : vector<16x1xf32> to vector<16x8xf32>
    %142 = arith.subf %132, %141 : vector<16x8xf32>
    %143 = vector.broadcast %140 : vector<16x1xf32> to vector<16x8xf32>
    %144 = arith.subf %142, %143 : vector<16x8xf32>
    %c0_52 = arith.constant 0 : index
    %c0_53 = arith.constant 0 : index
    %145 = vector.load %arg8[%c0_52, %c0_53] : memref<16x8xf32, #tpu.memory_space<vmem>>, vector<16x8xf32>
    tpu.vector_store %arg8[%c0_52, %c0_53], %144 {strides = array<i32>} : memref<16x8xf32, #tpu.memory_space<vmem>>, vector<16x8xf32>,
    return
  }
}

</mosaic_0001>

<bundles_post_ra>
// kernel: gat_net2_forward.1
= control target key start
LH: loop header
LB: loop body
LE: loop exit
PB: predicated region body
PF: predicated region fallthrough
CT: control target
= control target key end

     0   :  { %vm37_vm0 = vcmask 130048   ;;  %v1422_v11 = vmov 0.0   ;;  %vm1423_vm1 = vmmov 0   ;;  %v1424_v13 = vmov 2   ;;  %s1646_s2 = inlined_call_operand.vmem [shape: f32[16,48], index: 2, kind: input, shape index: {}]   ;;  %s1647_s0 = inlined_call_operand.vmem [shape: f32[16,16], index: 0, kind: input, shape index: {}]   ;;  %s1648_s4 = inlined_call_operand.vmem [shape: f32[48,4], index: 4, kind: input, shape index: {}]   ;;  %s1649_s1 = inlined_call_operand.vmem [shape: f32[16,16], index: 1, kind: input, shape index: {}]   ;;  %s1650_s3 = inlined_call_operand.vmem [shape: f32[2,48], index: 3, kind: input, shape index: {}]   ;;  %s1651_s5 = inlined_call_operand.vmem [shape: f32[32,12], index: 5, kind: input, shape index: {}]   ;;  %s1652_s7 = inlined_call_operand.vmem [shape: f32[12,2], index: 7, kind: input, shape index: {}]   ;;  %s1653_s6 = inlined_call_operand.vmem [shape: f32[1,12], index: 6, kind: input, shape index: {}]   ;;  %s1654_s8 = inlined_call_operand.vmem [shape: f32[16,8], index: 8, kind: output, shape index: {}]  }
   0x1   :  { %v124_v0 = vld [vmem:[%s1646_s2 + $0x8] sm:$0xff]  ;;  %v123_v1 = vld [vmem:[%s1646_s2] sm:$0xff]  ;;  %v129_v8 = vld [vmem:[%s1648_s4 + $0x18] sm:$0xff]  ;;  %1353 = vset.pattern.permute.xlu1 %v1424_v13  ;;  %v1425_v14 = vmov 0   ;;  %vm213_vm2 = vcmask 392192   ;;  %v1426_v24 = vmov 1   ;;  %v378_v26 = vlaneseq }
   0x2   :  { %v29_v2 = vld [vmem:[%s1647_s0] sm:$0xff]  ;;  %1263 = vmatprep.subr.mxu1 %v124_v0  ;;  %v30_v3 = vld [vmem:[%s1647_s0 + $0x8] sm:$0xff]  ;;  %v128_v9 = vld [vmem:[%s1648_s4 + $0x10] sm:$0xff]  ;;  %1352 = vset.pattern.permute.xlu0 %v1425_v14  ;;  %v1427_v25 = vmov 3   ;;  %v1428_v39 = vmov -1e+30  }
   0x3   :  { %1267 = vmatprep.mubr.msk.f32.mxu1 %vm37_vm0, %v29_v2  ;;  %1264 = vmatpush3.msra.mxu1 %v124_v0  ;;  %v131_v4 = vld [vmem:[%s1648_s4 + $0x28] sm:$0xff]  ;;  %v1501_v6 = vld [vmem:[%s1649_s1] sm:$0xff]  ;;  %v1536_v27 = vshrl.u32 %v378_v26, 7  ;;  %vm683_vm13 = vcmask 64512   ;;  %vm872_vm14 = vcmask 1043456   ;;  %vm688_vm15 = vcmask 195584  }
   0x4   :  { %v1495_v5 = vld [vmem:[%s1649_s1 + $0x8] sm:$0xff]  ;;  %1265 = vmatprep.subr.mxu1 %v123_v1  ;;  %v130_v7 = vld [vmem:[%s1648_s4 + $0x20] sm:$0xff]  ;;  %1260 = vmatprep.mubr.msk.f32.mxu0 %vm37_vm0, %v1501_v6  ;;  %v1175_v36 = vadd.f32 -1.0, %v1501_v6 }
   0x5   :  { %1256 = vmatprep.subr.mxu0 %v1495_v5  ;;  %1266 = vmatpush3.msra.mxu1 %v123_v1  ;;  %v127_v10 = vld [vmem:[%s1648_s4 + $0x8] sm:$0xff]  ;;  %v126_v12 = vld [vmem:[%s1648_s4] sm:$0xff]  ;;  %v380_v28 = vsub.s32 0, %v1536_v27  ;;  %v1176_v30 = vadd.f32 -1.0, %v1495_v5  ;;  %v420_v41 = vsub.s32 1, %v1536_v27 }
   0x6   :  { %1257 = vmatpush3.msra.mxu0 %v1495_v5  ;;  %1268 = vmatmul.mubr.msk.f32.vlgmr.msra.gmra.mxu1 %vm37_vm0, %v30_v3  ;;  %v125_v17 = vld [vmem:[%s1650_s3] sm:$0x3]  ;;  %v1550_v50 = vmul.f32 1e+30, %v1175_v36  ;;  %s1429_s3 = smov 16  }
   0x7   :  { %1277 = vmatprep.subr.mxu1 %v131_v4  ;;  %1258 = vmatprep.subr.mxu0 %v1501_v6  ;;  %v1542_v35 = vmul.f32 1e+30, %v1176_v30 }
   0x8   :  { %1278 = vmatpush3.msra.mxu1 %v131_v4  ;;  %1259 = vmatpush3.msra.mxu0 %v1501_v6 }
   0x9   :  { %1279 = vmatprep.subr.mxu1 %v130_v7  ;;  %1261 = vmatmul.mubr.msk.f32.vlgmr.msra.gmra.mxu0 %vm37_vm0, %v1495_v5 }
   0xa   :  { %1280 = vmatpush3.msra.mxu1 %v130_v7  ;;  %1270 = vmatprep.subr.mxu0 %v1422_v11 }
   0xb   :  { %1281 = vmatprep.subr.mxu1 %v129_v8  ;;  %1274 = vmatprep.mubr.msk.f32.mxu0 %vm1423_vm1, %v1422_v11 }
   0xc   :  { %1282 = vmatpush3.msra.mxu1 %v129_v8 }
   0xd   :  { %1283 = vmatprep.subr.mxu1 %v128_v9 }
   0xe   :  { %1284 = vmatpush3.msra.mxu1 %v128_v9 }
   0xf   :  { %1285 = vmatprep.subr.mxu1 %v127_v10 }
  0x10   :  { %1286 = vmatpush3.msra.mxu1 %v127_v10 }
  0x11   :  { %1287 = vmatprep.subr.mxu1 %v126_v12 }
  0x12   :  { %1288 = vmatpush3.msra.mxu1 %v126_v12 }
  0xc6   :  { %v1269_v15 = vpop.f32.mrf.mxu1 }
  0xc7   :  { %1271 = vmatpush3.xpose.msk.msra.mxu0 %vm213_vm2, %v1269_v15 }
  0xc8   :  { %v204_v16 = vpop.f32.mrf.mxu1  ;;  %1272 = vmatprep.subr.mxu0 %v1422_v11 }
  0xc9   :  { %1289 = vmatprep.mubr.msk.f32.mxu1 %vm213_vm2, %v204_v16  ;;  %v1262_v18 = vpop.f32.mrf.mxu0 }
  0xca   :  { %1290 = vmatmul.mubr.msk.f32.vlgmr.msra.gmra.mxu1 %vm213_vm2, %v1269_v15  ;;  %vm120_vm3 = vcmp.gt.f32.partialorder %v1262_v18, 0.0 }
  0xcb   :  { %1273 = vmatpush3.xpose.msk.msra.mxu0 %vm213_vm2, %v204_v16  ;;  %v110_v20 = vpop.f32.mrf.mxu0  ;;  %v1545_v40 = vsel %vm120_vm3, 0.0, %v1428_v39 }
  0xcc   :  { %1292 = vmatprep.subr.mxu0 %v1269_v15  ;;  %vm119_vm6 = vcmp.gt.f32.partialorder %v110_v20, 0.0 }
  0xcd   :  { %v1553_v59 = vsel %vm119_vm6, 0.0, %v1428_v39 }
  0xce   :  { %1275 = vmatmul.mubr.msk.f32.vlgmr.msra.gmra.mxu0 %vm213_vm2, %v125_v17 }
  0xcf   :  { %1293 = vmatpush3.msra.mxu0 %v1269_v15 }
  0xd0   :  { %1294 = vmatprep.subr.mxu0 %v204_v16 }
  0xd1   :  { %1295 = vmatpush3.msra.mxu0 %v204_v16 }
  0xd2   :  { %1319 = vmatprep.subr.mxu0 %v1422_v11 }
 0x18a   :  { %v1291_v19 = vpop.f32.mrf.mxu1 }
 0x18b   :  { %397 = vperm.xlu1 %1353, %v1291_v19   ;;  %375 = vperm.xlu0 %1352, %v1291_v19  }
 0x18c   :  { %v359_v21 = vpop.f32.mrf.mxu1 }
 0x18e   :  { %v289_v22 = vpop.f32.mrf.mxu0 }
 0x18f   :  { %393 = vperm.xlu1 %1353, %v359_v21   ;;  %370 = vperm.xlu0 %1352, %v359_v21   ;;  %v381_v29 = vrot.slane %v289_v22, %v380_v28  ;;  %v421_v53 = vrot.slane %v289_v22, %v420_v41 }
 0x190   :  { %v1276_v23 = vpop.f32.mrf.mxu0 }
 0x193   :  { %1354 = vset.pattern.permute.xlu1 %v1426_v24  ;;  %1355 = vset.pattern.permute.xlu0 %v1426_v24 }
 0x194   :  { %415 = vperm.xlu1 %1354, %v1291_v19   ;;  %411 = vperm.xlu0 %1355, %v359_v21  }
 0x198   :  { %1356 = vset.pattern.permute.xlu1 %v1427_v25  ;;  %1357 = vset.pattern.permute.xlu0 %v1427_v25 }
 0x199   :  { %433 = vperm.xlu1 %1356, %v359_v21   ;;  %437 = vperm.xlu0 %1357, %v1291_v19  }
 0x19d   :  { %1358 = vset.pattern.permute.xlu1 %v1425_v14  ;;  %1359 = vset.pattern.permute.xlu0 %v1425_v14 }
 0x206   :  { %v398_v31 = vpop.permute.xlu1 %397  ;;  %v376_v32 = vpop.permute.xlu0 %375 }
 0x207   :  { %v401_v33 = vadd.f32 %v398_v31, %v381_v29  ;;  %v383_v34 = vadd.f32 %v381_v29, %v376_v32 }
 0x209   :  { %vm403_vm4 = vcmp.gt.f32.partialorder %v401_v33, 0.0  ;;  %v405_v37 = vmul.f32 0.2, %v401_v33  ;;  %vm385_vm5 = vcmp.gt.f32.partialorder %v383_v34, 0.0  ;;  %v387_v38 = vmul.f32 0.2, %v383_v34 }
 0x20a   :  { %v394_v42 = vpop.permute.xlu1 %393  ;;  %v371_v43 = vpop.permute.xlu0 %370 }
 0x20b   :  { %v400_v44 = vadd.f32 %v394_v42, %v381_v29  ;;  %v382_v45 = vadd.f32 %v381_v29, %v371_v43  ;;  %v389_v46 = vsel %vm385_vm5, %v383_v34, %v387_v38  ;;  %v407_v47 = vsel %vm403_vm4, %v401_v33, %v405_v37 }
 0x20c   :  { %v391_v48 = vadd.f32 %v389_v46, %v1542_v35  ;;  %v409_v49 = vadd.f32 %v407_v47, %v1545_v40  ;;  %vm792_vm4 = vcmask 97280  }
 0x20d   :  { %vm402_vm7 = vcmp.gt.f32.partialorder %v400_v44, 0.0  ;;  %v404_v51 = vmul.f32 0.2, %v400_v44  ;;  %vm384_vm8 = vcmp.gt.f32.partialorder %v382_v45, 0.0  ;;  %v386_v52 = vmul.f32 0.2, %v382_v45 }
 0x20e   :  { %v453_v54 = vsel %vm37_vm0, %v391_v48, -inf  ;;  %v459_v63 = vsel %vm37_vm0, %v409_v49, -inf }
 0x20f   :  { %v416_v55 = vpop.permute.xlu1 %415  ;;  %v412_v56 = vpop.permute.xlu0 %411  ;;  %454 = vmax.xlane.f32.xlu0 %v453_v54  ;;  %v388_v57 = vsel %vm384_vm8, %v382_v45, %v386_v52  ;;  %v406_v58 = vsel %vm402_vm7, %v400_v44, %v404_v51 }
 0x210   :  { %v423_v60 = vadd.f32 %v421_v53, %v416_v55  ;;  %v422_v61 = vadd.f32 %v421_v53, %v412_v56  ;;  %v390_v62 = vadd.f32 %v388_v57, %v1550_v50  ;;  %v408_v0 = vadd.f32 %v406_v58, %v1553_v59 }
 0x212   :  { %vm425_vm9 = vcmp.gt.f32.partialorder %v423_v60, 0.0  ;;  %v427_v1 = vmul.f32 0.2, %v423_v60  ;;  %vm424_vm10 = vcmp.gt.f32.partialorder %v422_v61, 0.0  ;;  %v426_v2 = vmul.f32 0.2, %v422_v61 }
 0x213   :  { %460 = vmax.xlane.f32.xlu0 %v459_v63  ;;  %v450_v3 = vsel %vm37_vm0, %v390_v62, -inf  ;;  %v456_v12 = vsel %vm37_vm0, %v408_v0, -inf }
 0x214   :  { %451 = vmax.xlane.f32.xlu1 %v450_v3  ;;  %v434_v4 = vpop.permute.xlu1 %433  ;;  %v438_v5 = vpop.permute.xlu0 %437  ;;  %v429_v6 = vsel %vm425_vm9, %v423_v60, %v427_v1  ;;  %v428_v7 = vsel %vm424_vm10, %v422_v61, %v426_v2  ;;  %vm1142_vm9 = vcmask 31744  }
 0x215   :  { %v440_v8 = vadd.f32 %v434_v4, %v421_v53  ;;  %v441_v9 = vadd.f32 %v438_v5, %v421_v53  ;;  %v431_v10 = vadd.f32 %v429_v6, %v1542_v35  ;;  %v430_v13 = vadd.f32 %v428_v7, %v1550_v50 }
 0x217   :  { %vm442_vm11 = vcmp.gt.f32.partialorder %v440_v8, 0.0  ;;  %v444_v14 = vmul.f32 0.2, %v440_v8  ;;  %vm443_vm12 = vcmp.gt.f32.partialorder %v441_v9, 0.0  ;;  %v445_v15 = vmul.f32 0.2, %v441_v9 }
 0x218   :  { %457 = vmax.xlane.f32.xlu1 %v456_v12  ;;  %v465_v16 = vsel %vm37_vm0, %v431_v10, -inf  ;;  %v462_v20 = vsel %vm37_vm0, %v430_v13, -inf }
 0x219   :  { %466 = vmax.xlane.f32.xlu0 %v465_v16  ;;  %v447_v17 = vsel %vm443_vm12, %v441_v9, %v445_v15  ;;  %v446_v18 = vsel %vm442_vm11, %v440_v8, %v444_v14 }
 0x21a   :  { %v449_v19 = vadd.f32 %v447_v17, %v1545_v40  ;;  %v448_v21 = vadd.f32 %v446_v18, %v1553_v59 }
 0x21c   :  { %463 = vmax.xlane.f32.xlu1 %v462_v20  ;;  %v471_v22 = vsel %vm37_vm0, %v449_v19, -inf  ;;  %v468_v23 = vsel %vm37_vm0, %v448_v21, -inf }
 0x21d   :  { %472 = vmax.xlane.f32.xlu0 %v471_v22 }
 0x220   :  { %469 = vmax.xlane.f32.xlu1 %v468_v23 }
 0x298   :  { %v455_v25 = vpop.xlane.xlu0 %454 }
 0x299   :  { %v475_v26 = vsub.f32 %v391_v48, %v455_v25 }
 0x29b   :  { %v484_v29 = vmul.f32 1.442695, %v475_v26 }
 0x29c   :  { %v461_v30 = vpop.xlane.xlu0 %460 }
 0x29d   :  { %1362 = vpow2.f32 %v484_v29  ;;  %v477_v31 = vsub.f32 %v409_v49, %v461_v30  ;;  %v452_v32 = vpop.xlane.xlu1 %451 }
 0x29e   :  { %v474_v33 = vsub.f32 %v390_v62, %v452_v32 }
 0x29f   :  { %v488_v34 = vmul.f32 1.442695, %v477_v31 }
 0x2a0   :  { %v482_v36 = vmul.f32 1.442695, %v474_v33 }
 0x2a1   :  { %1364 = vpow2.f32 %v488_v34  ;;  %v458_v37 = vpop.xlane.xlu1 %457 }
 0x2a2   :  { %1366 = vpow2.f32 %v482_v36  ;;  %v476_v38 = vsub.f32 %v408_v0, %v458_v37  ;;  %v467_v39 = vpop.xlane.xlu0 %466 }
 0x2a3   :  { %v479_v41 = vsub.f32 %v431_v10, %v467_v39 }
 0x2a4   :  { %v486_v42 = vmul.f32 1.442695, %v476_v38 }
 0x2a5   :  { %v492_v43 = vmul.f32 1.442695, %v479_v41  ;;  %v464_v44 = vpop.xlane.xlu1 %463 }
 0x2a6   :  { %1368 = vpow2.f32 %v486_v42  ;;  %v478_v45 = vsub.f32 %v430_v13, %v464_v44  ;;  %v473_v46 = vpop.xlane.xlu0 %472 }
 0x2a7   :  { %1370 = vpow2.f32 %v492_v43  ;;  %v481_v47 = vsub.f32 %v449_v19, %v473_v46 }
 0x2a8   :  { %v490_v48 = vmul.f32 1.442695, %v478_v45 }
 0x2a9   :  { %v496_v49 = vmul.f32 1.442695, %v481_v47  ;;  %v470_v51 = vpop.xlane.xlu1 %469  ;;  %v706_v47 = vld [vmem:[%s1651_s5 + $0x18] sm:$0xff] }
 0x2aa   :  { %v1363_v52 = vpop.eup %1362  ;;  %1372 = vpow2.f32 %v490_v48  ;;  %v480_v53 = vsub.f32 %v448_v21, %v470_v51  ;;  %1308 = vmatprep.subr.mxu1 %v706_v47  ;;  %v705_v48 = vld [vmem:[%s1651_s5 + $0x10] sm:$0xff]  ;;  %v703_v51 = vld [vmem:[%s1651_s5] sm:$0xff] }
 0x2ab   :  { %1374 = vpow2.f32 %v496_v49  ;;  %v501_v54 = vsel %vm37_vm0, %v1363_v52, 0.0  ;;  %1309 = vmatpush3.msra.mxu1 %v706_v47  ;;  %v704_v49 = vld [vmem:[%s1651_s5 + $0x8] sm:$0xff] }
 0x2ac   :  { %v494_v55 = vmul.f32 1.442695, %v480_v53  ;;  %502 = vadd.xlane.f32.xlu0 %v501_v54  ;;  %1310 = vmatprep.subr.mxu1 %v705_v48 }
 0x2ad   :  { %1311 = vmatpush3.msra.mxu1 %v705_v48 }
 0x2ae   :  { %v1365_v56 = vpop.eup %1364  ;;  %1376 = vpow2.f32 %v494_v55  ;;  %1312 = vmatprep.subr.mxu1 %v704_v49 }
 0x2af   :  { %v1367_v57 = vpop.eup %1366  ;;  %v507_v58 = vsel %vm37_vm0, %v1365_v56, 0.0  ;;  %1313 = vmatpush3.msra.mxu1 %v704_v49 }
 0x2b0   :  { %508 = vadd.xlane.f32.xlu0 %v507_v58  ;;  %v498_v60 = vsel %vm37_vm0, %v1367_v57, 0.0  ;;  %1314 = vmatprep.subr.mxu1 %v703_v51 }
 0x2b1   :  { %499 = vadd.xlane.f32.xlu1 %v498_v60  ;;  %1315 = vmatpush3.msra.mxu1 %v703_v51 }
 0x2b3   :  { %v1369_v61 = vpop.eup %1368 }
 0x2b4   :  { %v1371_v62 = vpop.eup %1370  ;;  %v504_v63 = vsel %vm37_vm0, %v1369_v61, 0.0 }
 0x2b5   :  { %505 = vadd.xlane.f32.xlu1 %v504_v63  ;;  %v513_v0 = vsel %vm37_vm0, %v1371_v62, 0.0 }
 0x2b6   :  { %514 = vadd.xlane.f32.xlu0 %v513_v0 }
 0x2b7   :  { %v1373_v1 = vpop.eup %1372 }
 0x2b8   :  { %v1375_v2 = vpop.eup %1374  ;;  %v510_v3 = vsel %vm37_vm0, %v1373_v1, 0.0 }
 0x2b9   :  { %511 = vadd.xlane.f32.xlu1 %v510_v3  ;;  %v519_v4 = vsel %vm37_vm0, %v1375_v2, 0.0 }
 0x2ba   :  { %520 = vadd.xlane.f32.xlu0 %v519_v4 }
 0x2bb   :  { %v1377_v5 = vpop.eup %1376 }
 0x2bc   :  { %v516_v6 = vsel %vm37_vm0, %v1377_v5, 0.0 }
 0x2bd   :  { %517 = vadd.xlane.f32.xlu1 %v516_v6 }
 0x335   :  { %v503_v7 = vpop.xlane.xlu0 %502 }
 0x336   :  { %1378 = vrcp.f32 %v503_v7 }
 0x339   :  { %v509_v8 = vpop.xlane.xlu0 %508 }
 0x33a   :  { %v500_v9 = vpop.xlane.xlu1 %499 }
 0x33b   :  { %1380 = vrcp.f32 %v500_v9 }
 0x33c   :  { %1382 = vrcp.f32 %v509_v8  ;;  %v708_v8 = vld [vmem:[%s1652_s7] sm:$0xff] }
 0x33e   :  { %v506_v10 = vpop.xlane.xlu1 %505 }
 0x33f   :  { %1384 = vrcp.f32 %v506_v10  ;;  %v515_v12 = vpop.xlane.xlu0 %514 }
 0x340   :  { %1386 = vrcp.f32 %v515_v12  ;;  %v707_v12 = vld [vmem:[%s1653_s6] sm:$0x1]  ;;  %s1430_s6 = smov 4  }
 0x342   :  { %v512_v13 = vpop.xlane.xlu1 %511 }
 0x343   :  { %1388 = vrcp.f32 %v512_v13  ;;  %v521_v14 = vpop.xlane.xlu0 %520  ;;  %v1379_v16 = vpop.eup %1378 }
 0x344   :  { %1390 = vrcp.f32 %v521_v14  ;;  %v531_v19 = vmul.f32 %v1379_v16, %v1363_v52  ;;  %v709_v52 = vld [vmem:[%s1652_s7 + $0x8] sm:$0xf] }
 0x345   :  { %1326 = vmatprep.subr.msk.mxu1 %vm872_vm14, %v709_v52 }
 0x346   :  { %v518_v15 = vpop.xlane.xlu1 %517 }
 0x347   :  { %1392 = vrcp.f32 %v518_v15 }
 0x348   :  { %v1381_v17 = vpop.eup %1380 }
 0x349   :  { %v530_v18 = vmul.f32 %v1381_v17, %v1367_v57  ;;  %v1383_v20 = vpop.eup %1382 }
 0x34a   :  { %v533_v23 = vmul.f32 %v1383_v20, %v1365_v56 }
 0x34b   :  { %1296 = vmatprep.mubr.msk.f32.mxu0 %vm37_vm0, %v530_v18 }
 0x34c   :  { %v1385_v21 = vpop.eup %1384  ;;  %1297 = vmatmul.mubr.msk.f32.vlgmr.msra.gmra.mxu0 %vm37_vm0, %v531_v19 }
 0x34d   :  { %v532_v22 = vmul.f32 %v1385_v21, %v1369_v61  ;;  %v1387_v25 = vpop.eup %1386 }
 0x34e   :  { %v535_v30 = vmul.f32 %v1387_v25, %v1371_v62 }
 0x34f   :  { %1299 = vmatprep.mubr.msk.f32.mxu0 %vm37_vm0, %v532_v22 }
 0x350   :  { %v1389_v26 = vpop.eup %1388  ;;  %1300 = vmatmul.mubr.msk.f32.gmra.mxu0 %vm37_vm0, %v533_v23 }
 0x351   :  { %v534_v29 = vmul.f32 %v1389_v26, %v1373_v1  ;;  %v1391_v31 = vpop.eup %1390 }
 0x352   :  { %v537_v34 = vmul.f32 %v1391_v31, %v1375_v2 }
 0x353   :  { %1302 = vmatprep.mubr.msk.f32.mxu0 %vm37_vm0, %v534_v29 }
 0x354   :  { %v1393_v32 = vpop.eup %1392  ;;  %1303 = vmatmul.mubr.msk.f32.gmra.mxu0 %vm37_vm0, %v535_v30 }
 0x355   :  { %v536_v33 = vmul.f32 %v1393_v32, %v1377_v5 }
 0x357   :  { %1305 = vmatprep.mubr.msk.f32.mxu0 %vm37_vm0, %v536_v33 }
 0x358   :  { %1306 = vmatmul.mubr.msk.f32.gmra.mxu0 %vm37_vm0, %v537_v34 }
 0x359   :  { %1323 = vmatprep.mubr.msk.f32.mxu0 %vm1423_vm1, %v1422_v11  ;;  %vm710_vm1 = vcmask 261120  }
 0x40c   :  { %v1298_v36 = vpop.f32.mrf.mxu0 }
 0x40e   :  { %v628_v37 = vpop.f32.mrf.mxu0 }
 0x410   :  { %v1301_v38 = vpop.f32.mrf.mxu0 }
 0x411   :  { %671 = vrot.lane.b32.xlu0 %v1301_v38, %s1429_s3 }
 0x412   :  { %v638_v39 = vpop.f32.mrf.mxu0 }
 0x413   :  { %669 = vrot.lane.b32.xlu1 %v638_v39, %s1429_s3 }
 0x414   :  { %v1304_v41 = vpop.f32.mrf.mxu0 }
 0x415   :  { %v685_v42 = vsel %vm683_vm13, %v1298_v36, %v1304_v41 }
 0x416   :  { %v648_v43 = vpop.f32.mrf.mxu0 }
 0x417   :  { %v684_v44 = vsel %vm683_vm13, %v628_v37, %v648_v43 }
 0x418   :  { %v1307_v45 = vpop.f32.mrf.mxu0 }
 0x41a   :  { %v658_v46 = vpop.f32.mrf.mxu0 }
 0x41b   :  { %677 = vrot.lane.b32.xlu1 %v658_v46, %s1429_s3 }
 0x41f   :  { %679 = vrot.lane.b32.xlu1 %v1307_v45, %s1429_s3 }
 0x483   :  { %v672_v56 = vpop.permute.xlu0 %671 }
 0x484   :  { %v687_v60 = vsel %vm37_vm0, %v685_v42, %v672_v56 }
 0x485   :  { %v670_v53 = vpop.permute.xlu1 %669 }
 0x486   :  { %v686_v54 = vsel %vm37_vm0, %v684_v44, %v670_v53 }
 0x48d   :  { %v678_v55 = vpop.permute.xlu1 %677 }
 0x48e   :  { %v689_v57 = vsel %vm688_vm15, %v686_v54, %v678_v55 }
 0x48f   :  { %v693_v58 = vmin.f32 %v689_v57, 0.0  ;;  %vm691_vm2 = vcmp.gt.f32.partialorder %v689_v57, 0.0 }
 0x491   :  { %v695_v61 = vmul.f32 1.442695, %v693_v58  ;;  %v680_v62 = vpop.permute.xlu1 %679 }
 0x492   :  { %v690_v63 = vsel %vm688_vm15, %v687_v60, %v680_v62 }
 0x493   :  { %1394 = vpow2.f32 %v695_v61  ;;  %v694_v0 = vmin.f32 %v690_v63, 0.0  ;;  %vm692_vm3 = vcmp.gt.f32.partialorder %v690_v63, 0.0 }
 0x495   :  { %v697_v1 = vmul.f32 1.442695, %v694_v0 }
 0x497   :  { %1396 = vpow2.f32 %v697_v1 }
 0x4a0   :  { %v1395_v2 = vpop.eup %1394 }
 0x4a1   :  { %v1194_v3 = vadd.f32 -1.0, %v1395_v2 }
 0x4a3   :  { %v701_v4 = vsel %vm691_vm2, %v689_v57, %v1194_v3 }
 0x4a4   :  { %v1397_v5 = vpop.eup %1396  ;;  %1316 = vmatprep.mubr.msk.f32.mxu1 %vm710_vm1, %v701_v4 }
 0x4a5   :  { %v1195_v6 = vadd.f32 -1.0, %v1397_v5 }
 0x4a7   :  { %v702_v7 = vsel %vm692_vm3, %v690_v63, %v1195_v6 }
 0x4a8   :  { %1317 = vmatmul.mubr.msk.f32.vlgmr.msra.gmra.mxu1 %vm710_vm1, %v702_v7 }
 0x4a9   :  { %1327 = vmatpush3.msk.msra.mxu1 %vm872_vm14, %v709_v52 }
 0x4aa   :  { %1328 = vmatprep.subr.mxu1 %v708_v8 }
 0x4ab   :  { %1329 = vmatpush3.msra.mxu1 %v708_v8 }
 0x568   :  { %v1318_v9 = vpop.f32.mrf.mxu1 }
 0x569   :  { %1320 = vmatpush3.xpose.msk.msra.mxu0 %vm792_vm4, %v1318_v9  ;;  %1333 = vmatprep.subr.mxu1 %v1318_v9 }
 0x56a   :  { %v783_v10 = vpop.f32.mrf.mxu1  ;;  %1321 = vmatprep.subr.mxu0 %v1422_v11 }
 0x56b   :  { %1330 = vmatprep.mubr.msk.f32.mxu1 %vm792_vm4, %v783_v10 }
 0x56c   :  { %1331 = vmatmul.mubr.msk.f32.vlgmr.msra.gmra.mxu1 %vm792_vm4, %v1318_v9 }
 0x56d   :  { %1334 = vmatpush3.msra.mxu1 %v1318_v9  ;;  %1322 = vmatpush3.xpose.msk.msra.mxu0 %vm792_vm4, %v783_v10 }
 0x56e   :  { %1335 = vmatprep.subr.mxu1 %v783_v10 }
 0x56f   :  { %1336 = vmatpush3.msra.mxu1 %v783_v10 }
 0x570   :  { %1324 = vmatmul.mubr.msk.f32.vlgmr.msra.gmra.mxu0 %vm792_vm4, %v707_v12 }
 0x62c   :  { %v1332_v13 = vpop.f32.mrf.mxu1 }
 0x62d   :  { %958 = vperm.xlu1 %1358, %v1332_v13  }
 0x62e   :  { %v942_v14 = vpop.f32.mrf.mxu1 }
 0x62f   :  { %953 = vperm.xlu0 %1359, %v942_v14  }
 0x630   :  { %v868_v15 = vpop.f32.mrf.mxu0 }
 0x631   :  { %1360 = vset.pattern.permute.xlu1 %v1426_v24  ;;  %v964_v16 = vrot.slane %v868_v15, %v380_v28 }
 0x632   :  { %976 = vperm.xlu1 %1360, %v942_v14   ;;  %v1325_v11 = vpop.f32.mrf.mxu0 }
 0x633   :  { %1361 = vset.pattern.permute.xlu0 %v1426_v24 }
 0x634   :  { %980 = vperm.xlu0 %1361, %v1332_v13  }
 0x6a8   :  { %v959_v17 = vpop.permute.xlu1 %958 }
 0x6a9   :  { %v966_v18 = vadd.f32 %v964_v16, %v959_v17 }
 0x6aa   :  { %v954_v19 = vpop.permute.xlu0 %953 }
 0x6ab   :  { %vm968_vm5 = vcmp.gt.f32.partialorder %v966_v18, 0.0  ;;  %v970_v20 = vmul.f32 0.2, %v966_v18  ;;  %v965_v21 = vadd.f32 %v964_v16, %v954_v19 }
 0x6ad   :  { %vm967_vm6 = vcmp.gt.f32.partialorder %v965_v21, 0.0  ;;  %v969_v22 = vmul.f32 0.2, %v965_v21  ;;  %v977_v23 = vpop.permute.xlu1 %976  ;;  %v972_v25 = vsel %vm968_vm5, %v966_v18, %v970_v20 }
 0x6ae   :  { %v983_v26 = vadd.f32 %v977_v23, %v964_v16  ;;  %v974_v29 = vadd.f32 %v972_v25, %v1542_v35 }
 0x6af   :  { %v981_v30 = vpop.permute.xlu0 %980  ;;  %v971_v31 = vsel %vm967_vm6, %v965_v21, %v969_v22 }
 0x6b0   :  { %vm985_vm7 = vcmp.gt.f32.partialorder %v983_v26, 0.0  ;;  %v987_v24 = vmul.f32 0.2, %v983_v26  ;;  %v984_v32 = vadd.f32 %v981_v30, %v964_v16  ;;  %v996_v27 = vsel %vm37_vm0, %v974_v29, -inf }
 0x6b1   :  { %997 = vmax.xlane.f32.xlu0 %v996_v27  ;;  %v973_v28 = vadd.f32 %v971_v31, %v1550_v50 }
 0x6b2   :  { %vm986_vm8 = vcmp.gt.f32.partialorder %v984_v32, 0.0  ;;  %v988_v33 = vmul.f32 0.2, %v984_v32  ;;  %v989_v34 = vsel %vm985_vm7, %v983_v26, %v987_v24 }
 0x6b3   :  { %v993_v36 = vsel %vm37_vm0, %v973_v28, -inf  ;;  %v991_v37 = vadd.f32 %v989_v34, %v1553_v59 }
 0x6b4   :  { %994 = vmax.xlane.f32.xlu1 %v993_v36  ;;  %v990_v38 = vsel %vm986_vm8, %v984_v32, %v988_v33 }
 0x6b5   :  { %v999_v35 = vsel %vm37_vm0, %v991_v37, -inf  ;;  %v992_v39 = vadd.f32 %v990_v38, %v1545_v40 }
 0x6b7   :  { %v1002_v41 = vsel %vm37_vm0, %v992_v39, -inf }
 0x6b8   :  { %1000 = vmax.xlane.f32.xlu1 %v999_v35  ;;  %1003 = vmax.xlane.f32.xlu0 %v1002_v41 }
 0x73a   :  { %v998_v42 = vpop.xlane.xlu0 %997 }
 0x73b   :  { %v1006_v43 = vsub.f32 %v974_v29, %v998_v42 }
 0x73d   :  { %v1011_v50 = vmul.f32 1.442695, %v1006_v43  ;;  %v995_v44 = vpop.xlane.xlu1 %994 }
 0x73e   :  { %v1005_v45 = vsub.f32 %v973_v28, %v995_v44 }
 0x73f   :  { %1398 = vpow2.f32 %v1011_v50 }
 0x740   :  { %v1009_v46 = vmul.f32 1.442695, %v1005_v45 }
 0x741   :  { %v1001_v47 = vpop.xlane.xlu1 %1000  ;;  %v1004_v48 = vpop.xlane.xlu0 %1003 }
 0x742   :  { %1400 = vpow2.f32 %v1009_v46  ;;  %v1007_v59 = vsub.f32 %v991_v37, %v1001_v47  ;;  %v1008_v49 = vsub.f32 %v992_v39, %v1004_v48 }
 0x744   :  { %v1013_v51 = vmul.f32 1.442695, %v1007_v59  ;;  %v1015_v52 = vmul.f32 1.442695, %v1008_v49 }
 0x746   :  { %1402 = vpow2.f32 %v1013_v51 }
 0x747   :  { %1404 = vpow2.f32 %v1015_v52 }
 0x74c   :  { %v1399_v40 = vpop.eup %1398 }
 0x74d   :  { %v1020_v53 = vsel %vm37_vm0, %v1399_v40, 0.0 }
 0x74e   :  { %1021 = vadd.xlane.f32.xlu0 %v1020_v53 }
 0x74f   :  { %v1401_v54 = vpop.eup %1400 }
 0x750   :  { %v1017_v55 = vsel %vm37_vm0, %v1401_v54, 0.0 }
 0x751   :  { %1018 = vadd.xlane.f32.xlu1 %v1017_v55 }
 0x753   :  { %v1403_v56 = vpop.eup %1402 }
 0x754   :  { %v1405_v57 = vpop.eup %1404  ;;  %v1023_v58 = vsel %vm37_vm0, %v1403_v56, 0.0 }
 0x755   :  { %1024 = vadd.xlane.f32.xlu1 %v1023_v58  ;;  %v1026_v60 = vsel %vm37_vm0, %v1405_v57, 0.0 }
 0x756   :  { %1027 = vadd.xlane.f32.xlu0 %v1026_v60 }
 0x7d7   :  { %v1022_v61 = vpop.xlane.xlu0 %1021 }
 0x7d8   :  { %1406 = vrcp.f32 %v1022_v61 }
 0x7da   :  { %v1019_v62 = vpop.xlane.xlu1 %1018 }
 0x7db   :  { %1408 = vrcp.f32 %v1019_v62 }
 0x7de   :  { %v1025_v63 = vpop.xlane.xlu1 %1024 }
 0x7df   :  { %1410 = vrcp.f32 %v1025_v63  ;;  %v1028_v0 = vpop.xlane.xlu0 %1027 }
 0x7e0   :  { %1412 = vrcp.f32 %v1028_v0 }
 0x7e5   :  { %v1407_v1 = vpop.eup %1406 }
 0x7e6   :  { %v1034_v4 = vmul.f32 %v1407_v1, %v1399_v40 }
 0x7e8   :  { %v1409_v2 = vpop.eup %1408 }
 0x7e9   :  { %v1033_v3 = vmul.f32 %v1409_v2, %v1401_v54 }
 0x7eb   :  { %1337 = vmatprep.mubr.msk.f32.mxu1 %vm37_vm0, %v1033_v3 }
 0x7ec   :  { %v1411_v5 = vpop.eup %1410  ;;  %1338 = vmatmul.mubr.msk.f32.vlgmr.msra.gmra.mxu1 %vm37_vm0, %v1034_v4 }
 0x7ed   :  { %v1413_v6 = vpop.eup %1412  ;;  %v1035_v7 = vmul.f32 %v1411_v5, %v1403_v56 }
 0x7ee   :  { %v1036_v8 = vmul.f32 %v1413_v6, %v1405_v57 }
 0x7ef   :  { %1340 = vmatprep.mubr.msk.f32.mxu1 %vm37_vm0, %v1035_v7 }
 0x7f0   :  { %1341 = vmatmul.mubr.msk.f32.gmra.mxu1 %vm37_vm0, %v1036_v8 }
 0x8ac   :  { %v1339_v9 = vpop.f32.mrf.mxu1 }
 0x8ae   :  { %v1115_v10 = vpop.f32.mrf.mxu1 }
 0x8b0   :  { %v1342_v12 = vpop.f32.mrf.mxu1 }
 0x8b1   :  { %1138 = vrot.lane.b32.xlu0 %v1342_v12, %s1430_s6 }
 0x8b2   :  { %v1125_v13 = vpop.f32.mrf.mxu1 }
 0x8b3   :  { %1136 = vrot.lane.b32.xlu1 %v1125_v13, %s1430_s6 }
 0x923   :  { %v1139_v14 = vpop.permute.xlu0 %1138 }
 0x924   :  { %v1144_v15 = vsel %vm1142_vm9, %v1339_v9, %v1139_v14 }
 0x925   :  { %v1137_v11 = vpop.permute.xlu1 %1136  ;;  %v1148_v16 = vsel %vm683_vm13, %v1144_v15, -inf }
 0x926   :  { %1149 = vmax.xlane.f32.xlu0 %v1148_v16  ;;  %v1143_v17 = vsel %vm1142_vm9, %v1115_v10, %v1137_v11 }
 0x927   :  { %v1145_v18 = vsel %vm683_vm13, %v1143_v17, -inf }
 0x928   :  { %1146 = vmax.xlane.f32.xlu1 %v1145_v18 }
 0x9af   :  { %v1150_v19 = vpop.xlane.xlu0 %1149 }
 0x9b0   :  { %v1152_v20 = vsub.f32 %v1144_v15, %v1150_v19 }
 0x9b1   :  { %v1147_v21 = vpop.xlane.xlu1 %1146 }
 0x9b2   :  { %v1155_v22 = vmul.f32 1.442695, %v1152_v20  ;;  %v1151_v23 = vsub.f32 %v1143_v17, %v1147_v21 }
 0x9b4   :  { %1414 = vpow2.f32 %v1155_v22  ;;  %v1153_v25 = vmul.f32 1.442695, %v1151_v23 }
 0x9b6   :  { %1416 = vpow2.f32 %v1153_v25 }
 0x9c1   :  { %v1415_v26 = vpop.eup %1414 }
 0x9c2   :  { %v1160_v29 = vsel %vm683_vm13, %v1415_v26, 0.0 }
 0x9c3   :  { %v1417_v30 = vpop.eup %1416  ;;  %1161 = vadd.xlane.f32.xlu0 %v1160_v29 }
 0x9c4   :  { %v1157_v31 = vsel %vm683_vm13, %v1417_v30, 0.0 }
 0x9c5   :  { %1158 = vadd.xlane.f32.xlu1 %v1157_v31 }
 0xa4c   :  { %v1162_v24 = vpop.xlane.xlu0 %1161 }
 0xa4d   :  { %1418 = vlog2.f32 %v1162_v24 }
 0xa4e   :  { %v1159_v32 = vpop.xlane.xlu1 %1158 }
 0xa4f   :  { %1420 = vlog2.f32 %v1159_v32 }
 0xa5a   :  { %v1419_v27 = vpop.eup %1418 }
 0xa5b   :  { %v1166_v28 = vmul.f32 0.6931472, %v1419_v27 }
 0xa5c   :  { %v1421_v33 = vpop.eup %1420 }
 0xa5d   :  { %v1168_v34 = vsub.f32 %v1152_v20, %v1166_v28  ;;  %v1164_v36 = vmul.f32 0.6931472, %v1421_v33 }
 0xa5f   :  { %1170 = vst.msk [vmem:[%s1654_s8 + $0x8] sm:$0xff] %vm683_vm13, %v1168_v34  ;;  %v1167_v37 = vsub.f32 %v1151_v23, %v1164_v36 }
 0xa61   :  { %1169 = vst.msk [vmem:[%s1654_s8] sm:$0xff] %vm683_vm13, %v1167_v37 }

</bundles_post_ra>
